<compile_context>
chip_gen: v7x
topology: tpu7x:2x2x1
jax: 0.10.0
libtpu: 0.0.40
codegen_flags: <defaults>
</compile_context>

<pallas_src>
import functools

import jax
import jax.numpy as jnp
from jax.experimental import pallas as pl
from jax.experimental.pallas import tpu as pltpu

F = 32                 # in/hidden features of the head
PACK = 4               # batch elements packed per kernel row (4 * 32 = 128 lanes)
KN = PACK * F          # 128 : packed fc1 contraction / output width
ROW_ALIGN = 8 * PACK   # batch multiple keeping packed sublanes (8,128)-aligned


def _round_up(n, m):
    return (n + m - 1) // m * m


def normal_head_kernel(x_ref, w1_ref, b1_ref, w2_ref, b2_ref, o_ref):
    # x_ref : (tile_rows, 128)  packed input, 4 batch elements per row (streamed)
    # w1_ref: (128, 128)        block-diagonal fc1 weight (resident)
    # b1_ref: (1, 128)          fc1 bias tiled PACK times (resident)
    # w2_ref: (128, 128)        block-diagonal fc2 weight, cols >= PACK are zero (resident)
    # b2_ref: (1,)              fc2 bias scalar in SMEM
    # o_ref : (tile_rows, PACK) sigmoid(fc2) for the 4 packed batch elements per row

    # fc1 + ReLU: single lane-dense 128x128 MXU pass covers 4 batch elements per row.
    h = jnp.dot(x_ref[...], w1_ref[...], preferred_element_type=jnp.float32)
    h = jnp.maximum(h + b1_ref[...], 0.0)

    # fc2 on the MXU (no per-row lane reduce, no post-reduce relayout). Only the first
    # PACK columns of the padded result are meaningful.
    z_full = jnp.dot(h, w2_ref[...], preferred_element_type=jnp.float32)
    z = z_full[:, :PACK] + b2_ref[0]

    # Exact sigmoid; exp/recip go to the EUP slot and hide under the MXU-bound loop.
    o_ref[...] = (1.0 / (1.0 + jnp.exp(-z))).astype(o_ref.dtype)


@functools.partial(jax.jit, static_argnames=("tile_b",))
def normal_head(x, w1, b1, w2, b2, *, tile_b=32768):
    """NormalHead forward.

    x : (B, 32) f32
    w1: (32, 32) f32, laid out (in_features, out_features)  [== torch fc1.weight.T]
    b1: (32,)   f32
    w2: (32, 1) f32, laid out (in_features, out_features)   [== torch fc2.weight.T]
    b2: (1,)    f32
    returns: (B, 1) f32
    """
    B, f_in = x.shape
    assert f_in == F, f"expected {F} input features, got {f_in}"
    f32 = jnp.float32

    # ---- batch tiling (in units of ROW_ALIGN = 32 batch elements) ----
    tile_b = max(ROW_ALIGN, (int(tile_b) // ROW_ALIGN) * ROW_ALIGN)
    cap = _round_up(B, ROW_ALIGN)
    tile_b = min(tile_b, cap)
    # Prefer >= 2 grid steps so both TensorCores get work on v7x megacore.
    if tile_b == cap and cap >= 2 * ROW_ALIGN:
        tile_b = _round_up(cap // 2, ROW_ALIGN)
    b_pad = _round_up(B, tile_b)
    num_tiles = b_pad // tile_b

    if b_pad != B:
        x = jnp.pad(x, ((0, b_pad - B), (0, 0)))

    # Free (contiguous) repack: 4 batch elements per 128-lane row.
    x_packed = x.astype(f32).reshape(b_pad // PACK, KN)

    # ---- resident packed weights ----
    eye = jnp.eye(PACK, dtype=f32)
    w1_block = jnp.kron(eye, w1.astype(f32))                              # (128, 128)
    b1_row = jnp.tile(b1.astype(f32).reshape(1, F), (1, PACK))            # (1, 128)
    w2_block = jnp.kron(eye, w2.astype(f32).reshape(F, 1))                # (128, 4)
    w2_block = jnp.pad(w2_block, ((0, 0), (0, KN - PACK)))                # (128, 128)
    b2_s = b2.astype(f32).reshape(1)

    rows = b_pad // PACK
    tile_rows = tile_b // PACK

    xblk_bytes = tile_rows * KN * 4
    vmem_limit = min(max(32 << 20, 6 * xblk_bytes + (8 << 20)), 100 << 20)

    cost = pl.CostEstimate(
        flops=2 * rows * KN * (KN + KN),               # fc1 + (padded) fc2 MXU work
        transcendentals=rows * PACK,                   # one exp per batch element
        bytes_accessed=b_pad * (F + 1) * 4 + (KN * KN * 2 + KN + PACK + 1) * 4,
    )

    out = pl.pallas_call(
        normal_head_kernel,
        out_shape=jax.ShapeDtypeStruct((rows, PACK), jnp.float32),
        grid=(num_tiles,),
        in_specs=[
            pl.BlockSpec((tile_rows, KN), lambda i: (i, 0)),          # x, streamed
            pl.BlockSpec((KN, KN), lambda i: (0, 0)),                 # w1 block-diag, resident
            pl.BlockSpec((1, KN), lambda i: (0, 0)),                  # b1 row, resident
            pl.BlockSpec((KN, KN), lambda i: (0, 0)),                 # w2 block-diag, resident
            pl.BlockSpec(memory_space=pltpu.MemorySpace.SMEM),        # b2 scalar in SMEM
        ],
        out_specs=pl.BlockSpec((tile_rows, PACK), lambda i: (i, 0)),
        compiler_params=pltpu.CompilerParams(
            dimension_semantics=("parallel",),
            vmem_limit_bytes=int(vmem_limit),
        ),
        cost_estimate=cost,
    )(x_packed, w1_block, b1_row, w2_block, b2_s)

    # (rows, PACK) row-major == batch order -> (B, 1), dropping padded rows.
    return out.reshape(b_pad, 1)[:B]


def reference(x, w1, b1, w2, b2):
    h = jnp.maximum(x @ w1 + b1, 0.0)
    return jax.nn.sigmoid(h @ w2 + b2)


if __name__ == "__main__":
    key = jax.random.PRNGKey(0)
    k_x, k_w1, k_b1, k_w2, k_b2 = jax.random.split(key, 5)

    bound = 1.0 / jnp.sqrt(F)  # roughly PyTorch's default Linear init scale
    w1 = jax.random.uniform(k_w1, (F, F), jnp.float32, -bound, bound)   # (in, out)
    b1 = jax.random.uniform(k_b1, (F,), jnp.float32, -bound, bound)
    w2 = jax.random.uniform(k_w2, (F, 1), jnp.float32, -bound, bound)   # (in, out)
    b2 = jax.random.uniform(k_b2, (1,), jnp.float32, -bound, bound)

    # Tiny batch (single padded tile), mid batch (auto-split into 2 tiles for megacore),
    # and a many-tile non-aligned batch with an explicit small tile.
    for B, tile_b in ((8, 32768), (1000, 32768), (333, 64)):
        x = jax.random.normal(k_x, (B, F), dtype=jnp.float32)
        out = jax.block_until_ready(normal_head(x, w1, b1, w2, b2, tile_b=tile_b))
        ref = reference(x, w1, b1, w2, b2)
        assert out.shape == (B, 1), out.shape
        assert jnp.allclose(out, ref, atol=1e-5, rtol=1e-5), f"mismatch vs reference at B={B}"

    print("KERNEL_OK")
</pallas_src>

<mosaic_0001>
module attributes {stable_mosaic.version = 11 : i64} {
  func.func @normal_head_kernel(%arg0: i32, %arg1: memref<8x128xf32, #tpu.memory_space<vmem>>, %arg2: memref<128x128xf32, #tpu.memory_space<vmem>>, %arg3: memref<1x128xf32, #tpu.memory_space<vmem>>, %arg4: memref<128x128xf32, #tpu.memory_space<vmem>>, %arg5: memref<1xf32, #tpu.memory_space<smem>>, %arg6: memref<8x4xf32, #tpu.memory_space<vmem>>) attributes {dimension_semantics = [#tpu.dimension_semantics<parallel>], iteration_bounds = array<i64: 1>, scalar_prefetch = 0 : i64, scratch_operands = 0 : i64, tpu.core_type = #tpu.core_type<tc>, window_params = [{transform_indices = @transform_0, window_bounds = array<i64: 8, 128>}, {pipeline_mode = #tpu.pipeline_mode<synchronous>, transform_indices = @transform_1, window_bounds = array<i64: 128, 128>}, {pipeline_mode = #tpu.pipeline_mode<synchronous>, transform_indices = @transform_2, window_bounds = array<i64: 1, 128>}, {pipeline_mode = #tpu.pipeline_mode<synchronous>, transform_indices = @transform_3, window_bounds = array<i64: 128, 128>}, {transform_indices = @transform_4, window_bounds = array<i64: 1>}, {transform_indices = @transform_5, window_bounds = array<i64: 8, 4>}]} {
    %c0 = arith.constant 0 : index
    %c0_0 = arith.constant 0 : index
    %0 = vector.load %arg1[%c0, %c0_0] : memref<8x128xf32, #tpu.memory_space<vmem>>, vector<8x128xf32>
    %c0_1 = arith.constant 0 : index
    %c0_2 = arith.constant 0 : index
    %1 = vector.load %arg2[%c0_1, %c0_2] : memref<128x128xf32, #tpu.memory_space<vmem>>, vector<128x128xf32>
    %cst = arith.constant dense<0.000000e+00> : vector<8x128xf32>
    %2 = tpu.matmul %0, %1, %cst {dimension_numbers = #tpu.dot_dimension_numbers<[1], [0], [0], [1], [0, 0, 1, 1], [], []>} : vector<8x128xf32>, vector<128x128xf32>, vector<8x128xf32> -> vector<8x128xf32>
    %c0_3 = arith.constant 0 : index
    %c0_4 = arith.constant 0 : index
    %3 = vector.load %arg3[%c0_3, %c0_4] : memref<1x128xf32, #tpu.memory_space<vmem>>, vector<1x128xf32>
    %4 = vector.broadcast %3 : vector<1x128xf32> to vector<8x128xf32>
    %5 = arith.addf %2, %4 : vector<8x128xf32>
    %cst_5 = arith.constant 0.000000e+00 : f32
    %6 = vector.broadcast %cst_5 : f32 to vector<8x128xf32>
    %7 = arith.maximumf %5, %6 : vector<8x128xf32>
    %c0_6 = arith.constant 0 : index
    %c0_7 = arith.constant 0 : index
    %8 = vector.load %arg4[%c0_6, %c0_7] : memref<128x128xf32, #tpu.memory_space<vmem>>, vector<128x128xf32>
    %cst_8 = arith.constant dense<0.000000e+00> : vector<8x128xf32>
    %9 = tpu.matmul %7, %8, %cst_8 {dimension_numbers = #tpu.dot_dimension_numbers<[1], [0], [0], [1], [0, 0, 1, 1], [], []>} : vector<8x128xf32>, vector<128x128xf32>, vector<8x128xf32> -> vector<8x128xf32>
    %10 = vector.extract_strided_slice %9 {offsets = [0, 0], sizes = [8, 4], strides = [1, 1]} : vector<8x128xf32> to vector<8x4xf32>
    %c0_9 = arith.constant 0 : index
    %11 = memref.load %arg5[%c0_9] : memref<1xf32, #tpu.memory_space<smem>>
    %12 = vector.broadcast %11 : f32 to vector<8x4xf32>
    %13 = arith.addf %10, %12 : vector<8x4xf32>
    %cst_10 = arith.constant 0.000000e+00 : f32
    %14 = vector.broadcast %cst_10 : f32 to vector<8x4xf32>
    %15 = arith.subf %14, %13 : vector<8x4xf32>
    %16 = math.exp %15 : vector<8x4xf32>
    %cst_11 = arith.constant 1.000000e+00 : f32
    %17 = vector.broadcast %cst_11 : f32 to vector<8x4xf32>
    %18 = arith.addf %17, %16 : vector<8x4xf32>
    %cst_12 = arith.constant 1.000000e+00 : f32
    %19 = vector.broadcast %cst_12 : f32 to vector<8x4xf32>
    %20 = arith.divf %19, %18 : vector<8x4xf32>
    %c0_13 = arith.constant 0 : index
    %c0_14 = arith.constant 0 : index
    %21 = vector.load %arg6[%c0_13, %c0_14] : memref<8x4xf32, #tpu.memory_space<vmem>>, vector<8x4xf32>
    tpu.vector_store %arg6[%c0_13, %c0_14], %20 {strides = array<i32>} : memref<8x4xf32, #tpu.memory_space<vmem>>, vector<8x4xf32>,
    return
  }
  func.func @transform_0(%arg0: i32) -> (i32, i32) {
    %c0_i32 = arith.constant 0 : i32
    %c0_i32_0 = arith.constant 0 : i32
    return %arg0, %c0_i32 : i32, i32
  }
  func.func @transform_1(%arg0: i32) -> (i32, i32) {
    %c0_i32 = arith.constant 0 : i32
    %c0_i32_0 = arith.constant 0 : i32
    %c0_i32_1 = arith.constant 0 : i32
    return %c0_i32, %c0_i32_0 : i32, i32
  }
  func.func @transform_2(%arg0: i32) -> (i32, i32) {
    %c0_i32 = arith.constant 0 : i32
    %c0_i32_0 = arith.constant 0 : i32
    %c0_i32_1 = arith.constant 0 : i32
    return %c0_i32, %c0_i32_0 : i32, i32
  }
  func.func @transform_3(%arg0: i32) -> (i32, i32) {
    %c0_i32 = arith.constant 0 : i32
    %c0_i32_0 = arith.constant 0 : i32
    %c0_i32_1 = arith.constant 0 : i32
    return %c0_i32, %c0_i32_0 : i32, i32
  }
  func.func @transform_4(%arg0: i32) -> i32 {
    %c0_i32 = arith.constant 0 : i32
    %c0_i32_0 = arith.constant 0 : i32
    return %c0_i32 : i32
  }
  func.func @transform_5(%arg0: i32) -> (i32, i32) {
    %c0_i32 = arith.constant 0 : i32
    %c0_i32_0 = arith.constant 0 : i32
    return %arg0, %c0_i32 : i32, i32
  }
}

</mosaic_0001>

<bundles_post_ra>
// kernel: normal_head.1
= control target key start
LH: loop header
LB: loop body
LE: loop exit
PB: predicated region body
PF: predicated region fallthrough
CT: control target
= control target key end

     0   :  { %v377_v0 = vmov 0.0|0.0   ;;  %vm378_vm0 = vmmov 0   ;;  %v379_v4 = vmov 0.0   ;;  %vm211_vm1 = vcmask 31744   ;;  %s534_s1 = inlined_call_operand.vmem [shape: f32[128,128], index: 1, kind: input, shape index: {}]   ;;  %s535_s3 = inlined_call_operand.vmem [shape: f32[128,128], index: 3, kind: input, shape index: {}]   ;;  %s536_s0 = inlined_call_operand.vmem [shape: f32[8,128], index: 0, kind: input, shape index: {}]   ;;  %s537_s2 = inlined_call_operand.vmem [shape: f32[1,128], index: 2, kind: input, shape index: {}]   ;;  %s538_s4 = inlined_call_operand.<no memory space> [shape: f32[1], index: 4, kind: input, shape index: {}]   ;;  %s539_s5 = inlined_call_operand.vmem [shape: f32[8,4], index: 5, kind: output, shape index: {}]  }
   0x1   :  { %322 = vmatprep.subr.bf16.mxu0 %v377_v0  ;;  %v22_v1 = vld [vmem:[%s534_s1] sm:$0xff]  ;;  %v23_v2 = vld [vmem:[%s534_s1 + $0x8] sm:$0xff]  ;;  %v24_v3 = vld [vmem:[%s534_s1 + $0x10] sm:$0xff]  ;;  %284 = vmatprep.mubr.msk.f32.mxu0 %vm378_vm0, %v379_v4  ;;  %v203_v56 = vstv %s538_s4 }
   0x2   :  { %v323_v5 = vpack.c.bf16 %v23_v2, %v22_v1  ;;  %v25_v6 = vld [vmem:[%s534_s1 + $0x18] sm:$0xff]  ;;  %346 = vmatprep.subr.bf16.mxu1 %v377_v0  ;;  %319 = vmatprep.mubr.msk.f32.mxu1 %vm378_vm0, %v379_v4  ;;  %v26_v8 = vld [vmem:[%s534_s1 + $0x20] sm:$0xff]  ;;  %v27_v9 = vld [vmem:[%s534_s1 + $0x28] sm:$0xff] }
   0x3   :  { %v326_v7 = vpack.c.bf16 %v25_v6, %v24_v3  ;;  %v116_v10 = vld [vmem:[%s535_s3] sm:$0xff]  ;;  %v117_v11 = vld [vmem:[%s535_s3 + $0x8] sm:$0xff]  ;;  %v118_v12 = vld [vmem:[%s535_s3 + $0x10] sm:$0xff]  ;;  %v329_v14 = vpack.c.bf16 %v27_v9, %v26_v8 }
   0x4   :  { %324 = vmatpush3.bf16.msra.mxu0 %v323_v5  ;;  %v119_v13 = vld [vmem:[%s535_s3 + $0x18] sm:$0xff]  ;;  %v347_v15 = vpack.c.bf16 %v117_v11, %v116_v10  ;;  %v28_v16 = vld [vmem:[%s534_s1 + $0x30] sm:$0xff]  ;;  %v120_v19 = vld [vmem:[%s535_s3 + $0x20] sm:$0xff] }
   0x5   :  { %325 = vmatprep.subr.bf16.mxu0 %v377_v0  ;;  %v29_v17 = vld [vmem:[%s534_s1 + $0x38] sm:$0xff]  ;;  %v350_v18 = vpack.c.bf16 %v119_v13, %v118_v12  ;;  %v121_v20 = vld [vmem:[%s535_s3 + $0x28] sm:$0xff]  ;;  %v30_v22 = vld [vmem:[%s534_s1 + $0x40] sm:$0xff] }
   0x6   :  { %348 = vmatpush3.bf16.msra.mxu1 %v347_v15  ;;  %v332_v21 = vpack.c.bf16 %v29_v17, %v28_v16  ;;  %v31_v23 = vld [vmem:[%s534_s1 + $0x48] sm:$0xff]  ;;  %v353_v24 = vpack.c.bf16 %v121_v20, %v120_v19  ;;  %v122_v25 = vld [vmem:[%s535_s3 + $0x30] sm:$0xff]  ;;  %v123_v26 = vld [vmem:[%s535_s3 + $0x38] sm:$0xff] }
   0x7   :  { %349 = vmatprep.subr.bf16.mxu1 %v377_v0  ;;  %v335_v27 = vpack.c.bf16 %v31_v23, %v30_v22  ;;  %v32_v28 = vld [vmem:[%s534_s1 + $0x50] sm:$0xff]  ;;  %v33_v29 = vld [vmem:[%s534_s1 + $0x58] sm:$0xff]  ;;  %v356_v30 = vpack.c.bf16 %v123_v26, %v122_v25  ;;  %v124_v31 = vld [vmem:[%s535_s3 + $0x40] sm:$0xff] }
   0x8   :  { %327 = vmatpush3.bf16.msra.mxu0 %v326_v7  ;;  %v125_v32 = vld [vmem:[%s535_s3 + $0x48] sm:$0xff]  ;;  %v338_v33 = vpack.c.bf16 %v33_v29, %v32_v28  ;;  %v34_v34 = vld [vmem:[%s534_s1 + $0x60] sm:$0xff]  ;;  %v126_v37 = vld [vmem:[%s535_s3 + $0x50] sm:$0xff] }
   0x9   :  { %328 = vmatprep.subr.bf16.mxu0 %v377_v0  ;;  %v35_v35 = vld [vmem:[%s534_s1 + $0x68] sm:$0xff]  ;;  %v359_v36 = vpack.c.bf16 %v125_v32, %v124_v31  ;;  %v127_v38 = vld [vmem:[%s535_s3 + $0x58] sm:$0xff]  ;;  %v36_v40 = vld [vmem:[%s534_s1 + $0x70] sm:$0xff] }
   0xa   :  { %351 = vmatpush3.bf16.msra.mxu1 %v350_v18  ;;  %v341_v39 = vpack.c.bf16 %v35_v35, %v34_v34  ;;  %v37_v41 = vld [vmem:[%s534_s1 + $0x78] sm:$0xff]  ;;  %v362_v42 = vpack.c.bf16 %v127_v38, %v126_v37  ;;  %v128_v43 = vld [vmem:[%s535_s3 + $0x60] sm:$0xff]  ;;  %v129_v44 = vld [vmem:[%s535_s3 + $0x68] sm:$0xff] }
   0xb   :  { %352 = vmatprep.subr.bf16.mxu1 %v377_v0  ;;  %v344_v45 = vpack.c.bf16 %v37_v41, %v36_v40  ;;  %v365_v46 = vpack.c.bf16 %v129_v44, %v128_v43  ;;  %v21_v47 = vld [vmem:[%s536_s0] sm:$0xff]  ;;  %v130_v48 = vld [vmem:[%s535_s3 + $0x70] sm:$0xff]  ;;  %v131_v49 = vld [vmem:[%s535_s3 + $0x78] sm:$0xff] }
   0xc   :  { %330 = vmatpush3.bf16.msra.mxu0 %v329_v14  ;;  %v368_v50 = vpack.c.bf16 %v131_v49, %v130_v48  ;;  %v217_v51 = vld [vmem:[%s537_s2] ss:$0 sm:$0xff] }
   0xd   :  { %331 = vmatprep.subr.bf16.mxu0 %v377_v0 }
   0xe   :  { %354 = vmatpush3.bf16.msra.mxu1 %v353_v24 }
   0xf   :  { %355 = vmatprep.subr.bf16.mxu1 %v377_v0 }
  0x10   :  { %333 = vmatpush3.bf16.msra.mxu0 %v332_v21 }
  0x11   :  { %334 = vmatprep.subr.bf16.mxu0 %v377_v0 }
  0x12   :  { %357 = vmatpush3.bf16.msra.mxu1 %v356_v30 }
  0x13   :  { %358 = vmatprep.subr.bf16.mxu1 %v377_v0 }
  0x14   :  { %336 = vmatpush3.bf16.msra.mxu0 %v335_v27 }
  0x15   :  { %337 = vmatprep.subr.bf16.mxu0 %v377_v0 }
  0x16   :  { %360 = vmatpush3.bf16.msra.mxu1 %v359_v36 }
  0x17   :  { %361 = vmatprep.subr.bf16.mxu1 %v377_v0 }
  0x18   :  { %339 = vmatpush3.bf16.msra.mxu0 %v338_v33 }
  0x19   :  { %340 = vmatprep.subr.bf16.mxu0 %v377_v0 }
  0x1a   :  { %363 = vmatpush3.bf16.msra.mxu1 %v362_v42 }
  0x1b   :  { %364 = vmatprep.subr.bf16.mxu1 %v377_v0 }
  0x1c   :  { %342 = vmatpush3.bf16.msra.mxu0 %v341_v39 }
  0x1d   :  { %343 = vmatprep.subr.bf16.mxu0 %v377_v0 }
  0x1e   :  { %366 = vmatpush3.bf16.msra.mxu1 %v365_v46 }
  0x1f   :  { %367 = vmatprep.subr.bf16.mxu1 %v377_v0 }
  0x20   :  { %345 = vmatpush3.bf16.msra.mxu0 %v344_v45 }
  0x22   :  { %369 = vmatpush3.bf16.msra.mxu1 %v368_v50 }
  0x23   :  { %285 = vmatmul.mubr.f32.vlgmr.msra.gmra.mrb[0].mxu0 %v21_v47 }
  0xf6   :  { %v111_v52 = vpop.f32.mrb[0].mxu0 }
  0xf7   :  { %v112_v53 = vadd.f32 %v217_v51, %v111_v52  ;;  %v286_v54 = vpop.f32.mrb[1].mxu0 }
  0xf9   :  { %v115_v55 = vmax.f32 %v112_v53, 0.0 }
  0xfb   :  { %320 = vmatmul.mubr.f32.vlgmr.msra.gmra.mrb[0].mxu1 %v115_v55 }
 0x1ce   :  { %v198_v57 = vpop.f32.mrb[0].mxu1 }
 0x1cf   :  { %v204_v58 = vadd.f32 %v203_v56, %v198_v57  ;;  %v321_v59 = vpop.f32.mrb[1].mxu1 }
 0x1d1   :  { %v205_v60 = vsub.f32 0.0, %v204_v58 }
 0x1d3   :  { %v206_v61 = vmul.f32 1.442695, %v205_v60 }
 0x1d5   :  { %373 = vpow2.f32 %v206_v61 }
 0x1df   :  { %v374_v62 = vpop.eup %373 }
 0x1e0   :  { %v208_v63 = vadd.f32 1.0, %v374_v62 }
 0x1e2   :  { %375 = vrcp.f32 %v208_v63 }
 0x1ec   :  { %v376_v0 = vpop.eup %375 }
 0x1ed   :  { %212 = vst.msk [vmem:[%s539_s5] sm:$0xff] %vm211_vm1, %v376_v0 }

</bundles_post_ra>
